<compile_context>
chip_gen: v7x
topology: tpu7x:2x2x1
jax: 0.10.0
libtpu: 0.0.40
codegen_flags: <defaults>
</compile_context>

<pallas_src>
import functools

import jax
import jax.numpy as jnp
from jax import lax
from jax.experimental import pallas as pl
from jax.experimental.pallas import tpu as pltpu


def _stable_softplus(a):
    # log(1 + exp(a)) == max(a, 0) + log(1 + exp(-|a|)); one exp + one log (EUP),
    # never overflows regardless of the scale s.
    return jnp.maximum(a, 0.0) + jnp.log(1.0 + jnp.exp(-jnp.abs(a)))


def _uti_loss_kernel(x_ref, w_ref, lab_ref, o_ref,
                     row_max, row_acc, bias_acc, loss_acc,
                     *, m, s, batch_size, num_classes, tile_c, padded):
    p = pl.program_id(0)    # 0 = bias (logsumexp) pass, 1 = loss pass
    ci = pl.program_id(1)   # class tile (weight tile stays VMEM-resident over bi)
    bi = pl.program_id(2)   # batch tile (fastest axis)
    nc = pl.num_programs(1)
    nb = pl.num_programs(2)

    NEG_BIG = jnp.float32(-1e30)      # finite -inf stand-in: exp underflows to 0
    inv_b = jnp.float32(1.0 / batch_size)
    s_f = jnp.float32(s)
    sm_f = jnp.float32(s * m)
    tb = row_max.shape[1]

    # ---- one-time init of the global scalar accumulators -----------------------
    @pl.when((p == 0) & (ci == 0) & (bi == 0))
    def _():
        bias_acc[...] = jnp.zeros_like(bias_acc)
        loss_acc[...] = jnp.zeros_like(loss_acc)

    # ---- per-(pass, batch-tile) init of the persistent row state ---------------
    @pl.when((p == 0) & (ci == 0))
    def _():
        row_max[bi] = jnp.full((tb, 1), NEG_BIG, jnp.float32)
        row_acc[bi] = jnp.zeros((tb, 1), jnp.float32)

    @pl.when((p == 1) & (ci == 0))
    def _():
        row_acc[bi] = jnp.zeros((tb, 1), jnp.float32)   # reused as loss-row accum

    # ---- cos for this (class, batch) tile: inputs are pre-normalized -----------
    # Contract last dims of both operands ('md,nd->mn'): no transposed weight copy.
    cos = lax.dot_general(x_ref[...], w_ref[...], (((1,), (1,)), ((), ())),
                          preferred_element_type=jnp.float32)       # (tb, tc) f32

    lab = lab_ref[...]                                              # (tb, 1) int32
    col = lax.broadcasted_iota(jnp.int32, cos.shape, 1) + ci * tile_c
    one_hot = col == lab                                            # (tb, tc) bool

    # ---- pass 0: online logsumexp over non-target (and non-padded) columns -----
    @pl.when(p == 0)
    def _():
        z = jnp.where(one_hot, NEG_BIG, s_f * cos)
        if padded:
            z = jnp.where(col < num_classes, z, NEG_BIG)
        m_prev = row_max[bi]
        m_new = jnp.maximum(m_prev, jnp.max(z, axis=-1, keepdims=True))
        row_acc[bi] = (row_acc[bi] * jnp.exp(m_prev - m_new)
                       + jnp.sum(jnp.exp(z - m_new), axis=-1, keepdims=True))
        row_max[bi] = m_new

        @pl.when(ci == nc - 1)
        def _():
            lse = row_max[bi] + jnp.log(row_acc[bi])                # (tb, 1)
            bias_acc[...] += jnp.sum(lse, axis=0, keepdims=True)    # (1, 1)

    # ---- pass 1: loss with the now-known bias -----------------------------------
    @pl.when(p == 1)
    def _():
        bias = bias_acc[...] * inv_b                                # (1, 1)
        # Non-target branch over the whole tile ...
        sp_n = _stable_softplus(jnp.clip(s_f * cos - bias, -s_f, s_f))
        if padded:
            sp_n = jnp.where(col < num_classes, sp_n, 0.0)
        row_loss = jnp.sum(sp_n, axis=-1, keepdims=True)            # (tb, 1)

        # ... plus a per-row correction for the (at most one) target column.
        cos_t = jnp.sum(jnp.where(one_hot, cos, 0.0), axis=-1, keepdims=True)
        has_t = jnp.sum(one_hot.astype(jnp.float32), axis=-1, keepdims=True)
        base_t = s_f * cos_t - bias
        corr = (_stable_softplus(-jnp.clip(base_t - sm_f, -s_f, s_f))
                - _stable_softplus(jnp.clip(base_t, -s_f, s_f)))
        row_acc[bi] = row_acc[bi] + row_loss + has_t * corr

        @pl.when(ci == nc - 1)
        def _():
            loss_acc[...] += jnp.sum(row_acc[bi], axis=0, keepdims=True)

            @pl.when(bi == nb - 1)
            def _():
                o_ref[...] = loss_acc[...] * inv_b


def _l2_normalize(v, eps):
    vf = v.astype(jnp.float32)
    ss = jnp.sum(vf * vf, axis=-1, keepdims=True)
    # x * rsqrt(max(ss, eps^2)) == x / max(||x||, eps)  (exactly, by monotonicity)
    return vf * lax.rsqrt(jnp.maximum(ss, jnp.float32(eps) * jnp.float32(eps)))


def unified_threshold_loss(x, label, feat_mem, *, m=0.1, s=64.0, eps=1e-5,
                           compute_dtype=jnp.bfloat16,
                           block_b=1024, block_c=None,
                           vmem_budget_bytes=20 * 1024 * 1024):
    """x: (B, in_features); label: (B,) int; feat_mem: (out_features, in_features)."""
    B, D = x.shape
    C, D2 = feat_mem.shape
    assert D == D2

    # Pre-normalize once in f32 (one XLA pass), then cast to the streaming dtype.
    xn = _l2_normalize(x, eps).astype(compute_dtype)
    wn = _l2_normalize(feat_mem, eps).astype(compute_dtype)
    label2d = label.reshape(B, 1).astype(jnp.int32)
    itemsize = jnp.dtype(compute_dtype).itemsize

    # ---- batch tile: prefer a single resident x tile (nb == 1) ------------------
    x_budget = 8 * 1024 * 1024
    if B <= block_b and 2 * B * D * itemsize <= x_budget:
        tb = B
    else:
        tb = 0
        t = (min(block_b, B) // 8) * 8
        while t >= 8:
            if B % t == 0:
                tb = t
                break
            t -= 8
        if tb == 0:
            tb = B   # TODO(synk): pad + mask rows for huge prime-ish batch sizes
    nb = B // tb

    # ---- class tile: largest lane-dense tile fitting the VMEM budget ------------
    lane_q = 128
    w_budget = vmem_budget_bytes - 2 * tb * D * itemsize - (2 << 20)
    tc = max(lane_q, (w_budget // (2 * D * itemsize)) // lane_q * lane_q)
    tc = min(tc, 4096)
    c_up = ((C + lane_q - 1) // lane_q) * lane_q
    tc = min(tc, c_up)
    if block_c is not None:
        tc = max(lane_q, min(tc, (block_c // lane_q) * lane_q))
    c_pad = ((C + tc - 1) // tc) * tc
    nc = c_pad // tc
    if c_pad != C:
        wn = jnp.pad(wn, ((0, c_pad - C), (0, 0)))   # padded cols masked in-kernel

    vmem_need = (2 * (tc + tb) * D * itemsize                      # dbl-buffered tiles
                 + 2 * nb * (((tb + 7) // 8) * 8) * 128 * 4        # row scratches
                 + (1 << 20))
    vmem_limit = int(min(48 << 20, max(32 << 20, vmem_need + (8 << 20))))

    kernel = functools.partial(
        _uti_loss_kernel, m=float(m), s=float(s), batch_size=B,
        num_classes=C, tile_c=tc, padded=(c_pad != C))

    out = pl.pallas_call(
        kernel,
        out_shape=jax.ShapeDtypeStruct((1, 1), jnp.float32),
        grid_spec=pltpu.PrefetchScalarGridSpec(
            num_scalar_prefetch=0,
            # (pass, class-tiles, batch-tiles): batch fastest, so each weight tile is
            # DMA'd once per pass (2 full feat_mem sweeps total, independent of nb).
            grid=(2, nc, nb),
            in_specs=[
                pl.BlockSpec((tb, D), lambda p, ci, bi: (bi, 0)),   # normalized x
                pl.BlockSpec((tc, D), lambda p, ci, bi: (ci, 0)),   # normalized weights
                pl.BlockSpec((tb, 1), lambda p, ci, bi: (bi, 0)),   # labels
            ],
            out_specs=pl.BlockSpec((1, 1), lambda p, ci, bi: (0, 0)),
            scratch_shapes=[
                pltpu.VMEM((nb, tb, 1), jnp.float32),   # per-row running max (LSE)
                pltpu.VMEM((nb, tb, 1), jnp.float32),   # per-row running sum / loss rows
                pltpu.VMEM((1, 1), jnp.float32),        # sum_b logsumexp_b (-> bias)
                pltpu.VMEM((1, 1), jnp.float32),        # total loss accumulator
            ]),
        compiler_params=pltpu.CompilerParams(
            # Every axis carries globally coupled accumulators (bias is a batch mean),
            # so all axes are sequential reductions.
            dimension_semantics=("arbitrary", "arbitrary", "arbitrary"),
            vmem_limit_bytes=vmem_limit),
    )(xn, wn, label2d)
    return out[0, 0]


def _reference(x, label, feat_mem, *, m=0.1, s=64.0, eps=1e-5):
    xn = x / jnp.maximum(jnp.linalg.norm(x, axis=-1, keepdims=True), eps)
    wn = feat_mem / jnp.maximum(jnp.linalg.norm(feat_mem, axis=-1, keepdims=True), eps)
    cos = xn @ wn.T
    B, C = cos.shape
    one_hot = jax.nn.one_hot(label, C, dtype=jnp.bool_)
    z = jnp.where(one_hot, -jnp.inf, s * cos)
    bias = jnp.mean(jax.nn.logsumexp(z, axis=-1))
    p_loss = jnp.log(1.0 + jnp.exp(-jnp.clip(s * (cos - m) - bias, -s, s)))
    n_loss = jnp.log(1.0 + jnp.exp(jnp.clip(s * cos - bias, -s, s)))
    loss = jnp.where(one_hot, p_loss, n_loss)
    return jnp.mean(jnp.sum(loss, axis=1))


if __name__ == "__main__":
    # ---- test 1: module-sized shapes, single-tile path ---------------------------
    B, in_features, out_features = 8, 32, 128
    key = jax.random.PRNGKey(0)
    kx, kw, kl = jax.random.split(key, 3)
    x = jax.random.normal(kx, (B, in_features), dtype=jnp.float32)
    # deterministic synthetic "buffer" init (PyTorch leaves feat_mem uninitialized)
    feat_mem = jax.random.normal(kw, (out_features, in_features), dtype=jnp.float32)
    label = jax.random.randint(kl, (B,), 0, out_features, dtype=jnp.int32)

    ref = _reference(x, label, feat_mem, m=0.1, s=64.0)

    # Exact-precision path (f32 operands): tight check against the reference.
    loss_f32 = unified_threshold_loss(x, label, feat_mem, m=0.1, s=64.0,
                                      compute_dtype=jnp.float32)
    jax.block_until_ready(loss_f32)
    assert jnp.allclose(loss_f32, ref, rtol=2e-3, atol=2e-3), (loss_f32, ref)

    # Performance path (bf16 operands, f32 accumulation): loosened tolerance since
    # s=64 amplifies the ~1e-3 bf16 cos quantization before the exp.
    loss_bf16 = unified_threshold_loss(x, label, feat_mem, m=0.1, s=64.0,
                                       compute_dtype=jnp.bfloat16)
    jax.block_until_ready(loss_bf16)
    assert jnp.allclose(loss_bf16, ref, rtol=5e-2, atol=5e-2), (loss_bf16, ref)

    # ---- test 2: multi-tile batch + padded/masked class axis ---------------------
    B2, D2_, C2 = 16, 128, 200
    k2x, k2w, k2l = jax.random.split(jax.random.PRNGKey(1), 3)
    x2 = jax.random.normal(k2x, (B2, D2_), dtype=jnp.float32)
    w2 = jax.random.normal(k2w, (C2, D2_), dtype=jnp.float32)
    l2 = jax.random.randint(k2l, (B2,), 0, C2, dtype=jnp.int32)

    ref2 = _reference(x2, l2, w2, m=0.2, s=30.0)
    loss2 = unified_threshold_loss(x2, l2, w2, m=0.2, s=30.0,
                                   compute_dtype=jnp.float32,
                                   block_b=8, block_c=128)   # nb=2, nc=2, 56 padded cols
    jax.block_until_ready(loss2)
    assert jnp.allclose(loss2, ref2, rtol=2e-3, atol=2e-3), (loss2, ref2)

    print("KERNEL_OK")
</pallas_src>

<mosaic_0001>
module attributes {stable_mosaic.version = 11 : i64} {
  func.func @_uti_loss_kernel(%arg0: i32, %arg1: i32, %arg2: i32, %arg3: memref<8x32xf32, #tpu.memory_space<vmem>>, %arg4: memref<128x32xf32, #tpu.memory_space<vmem>>, %arg5: memref<8x1xi32, #tpu.memory_space<vmem>>, %arg6: memref<1x1xf32, #tpu.memory_space<vmem>>, %arg7: memref<1x8x1xf32, #tpu.memory_space<vmem>>, %arg8: memref<1x8x1xf32, #tpu.memory_space<vmem>>, %arg9: memref<1x1xf32, #tpu.memory_space<vmem>>, %arg10: memref<1x1xf32, #tpu.memory_space<vmem>>) attributes {dimension_semantics = [#tpu.dimension_semantics<arbitrary>, #tpu.dimension_semantics<arbitrary>, #tpu.dimension_semantics<arbitrary>], iteration_bounds = array<i64: 2, 1, 1>, scalar_prefetch = 0 : i64, scratch_operands = 4 : i64, tpu.core_type = #tpu.core_type<tc>, window_params = [{transform_indices = @transform_0, window_bounds = array<i64: 8, 32>}, {transform_indices = @transform_1, window_bounds = array<i64: 128, 32>}, {transform_indices = @transform_2, window_bounds = array<i64: 8, 1>}, {pipeline_mode = #tpu.pipeline_mode<synchronous>, transform_indices = @transform_3, window_bounds = array<i64: 1, 1>}]} {
    %c0_i32 = arith.constant 0 : i32
    %0 = arith.cmpi eq, %arg0, %c0_i32 : i32
    %c0_i32_0 = arith.constant 0 : i32
    %1 = arith.cmpi eq, %arg1, %c0_i32_0 : i32
    %2 = arith.andi %0, %1 : i1
    %c0_i32_1 = arith.constant 0 : i32
    %3 = arith.cmpi eq, %arg2, %c0_i32_1 : i32
    %4 = arith.andi %2, %3 : i1
    %5 = arith.extui %4 : i1 to i32
    %c0_i32_2 = arith.constant 0 : i32
    %6 = arith.cmpi ne, %5, %c0_i32_2 : i32
    scf.if %6 {
      %cst_23 = arith.constant 0.000000e+00 : f32
      %33 = vector.broadcast %cst_23 : f32 to vector<1x1xf32>
      %c0_24 = arith.constant 0 : index
      %c0_25 = arith.constant 0 : index
      %34 = vector.load %arg9[%c0_24, %c0_25] : memref<1x1xf32, #tpu.memory_space<vmem>>, vector<1x1xf32>
      tpu.vector_store %arg9[%c0_24, %c0_25], %33 {strides = array<i32>} : memref<1x1xf32, #tpu.memory_space<vmem>>, vector<1x1xf32>,
      %cst_26 = arith.constant 0.000000e+00 : f32
      %35 = vector.broadcast %cst_26 : f32 to vector<1x1xf32>
      %c0_27 = arith.constant 0 : index
      %c0_28 = arith.constant 0 : index
      %36 = vector.load %arg10[%c0_27, %c0_28] : memref<1x1xf32, #tpu.memory_space<vmem>>, vector<1x1xf32>
      tpu.vector_store %arg10[%c0_27, %c0_28], %35 {strides = array<i32>} : memref<1x1xf32, #tpu.memory_space<vmem>>, vector<1x1xf32>,
    } else {
    }
    %c0_i32_3 = arith.constant 0 : i32
    %7 = arith.cmpi eq, %arg0, %c0_i32_3 : i32
    %c0_i32_4 = arith.constant 0 : i32
    %8 = arith.cmpi eq, %arg1, %c0_i32_4 : i32
    %9 = arith.andi %7, %8 : i1
    %10 = arith.extui %9 : i1 to i32
    %cst = arith.constant -1.000000e+30 : f32
    %c0_i32_5 = arith.constant 0 : i32
    %11 = arith.cmpi ne, %10, %c0_i32_5 : i32
    scf.if %11 {
      %33 = vector.broadcast %cst : f32 to vector<8x1xf32>
      %34 = arith.index_cast %arg2 : i32 to index
      %c0_23 = arith.constant 0 : index
      %c0_24 = arith.constant 0 : index
      %35 = vector.load %arg7[%34, %c0_23, %c0_24] : memref<1x8x1xf32, #tpu.memory_space<vmem>>, vector<1x8x1xf32>
      %36 = vector.shape_cast %35 : vector<1x8x1xf32> to vector<8x1xf32>
      %37 = vector.shape_cast %33 : vector<8x1xf32> to vector<1x8x1xf32>
      tpu.vector_store %arg7[%34, %c0_23, %c0_24], %37 {strides = array<i32>} : memref<1x8x1xf32, #tpu.memory_space<vmem>>, vector<1x8x1xf32>,
      %cst_25 = arith.constant 0.000000e+00 : f32
      %38 = vector.broadcast %cst_25 : f32 to vector<8x1xf32>
      %39 = arith.index_cast %arg2 : i32 to index
      %c0_26 = arith.constant 0 : index
      %c0_27 = arith.constant 0 : index
      %40 = vector.load %arg8[%39, %c0_26, %c0_27] : memref<1x8x1xf32, #tpu.memory_space<vmem>>, vector<1x8x1xf32>
      %41 = vector.shape_cast %40 : vector<1x8x1xf32> to vector<8x1xf32>
      %42 = vector.shape_cast %38 : vector<8x1xf32> to vector<1x8x1xf32>
      tpu.vector_store %arg8[%39, %c0_26, %c0_27], %42 {strides = array<i32>} : memref<1x8x1xf32, #tpu.memory_space<vmem>>, vector<1x8x1xf32>,
    } else {
    }
    %c1_i32 = arith.constant 1 : i32
    %12 = arith.cmpi eq, %arg0, %c1_i32 : i32
    %c0_i32_6 = arith.constant 0 : i32
    %13 = arith.cmpi eq, %arg1, %c0_i32_6 : i32
    %14 = arith.andi %12, %13 : i1
    %15 = arith.extui %14 : i1 to i32
    %c0_i32_7 = arith.constant 0 : i32
    %16 = arith.cmpi ne, %15, %c0_i32_7 : i32
    scf.if %16 {
      %cst_23 = arith.constant 0.000000e+00 : f32
      %33 = vector.broadcast %cst_23 : f32 to vector<8x1xf32>
      %34 = arith.index_cast %arg2 : i32 to index
      %c0_24 = arith.constant 0 : index
      %c0_25 = arith.constant 0 : index
      %35 = vector.load %arg8[%34, %c0_24, %c0_25] : memref<1x8x1xf32, #tpu.memory_space<vmem>>, vector<1x8x1xf32>
      %36 = vector.shape_cast %35 : vector<1x8x1xf32> to vector<8x1xf32>
      %37 = vector.shape_cast %33 : vector<8x1xf32> to vector<1x8x1xf32>
      tpu.vector_store %arg8[%34, %c0_24, %c0_25], %37 {strides = array<i32>} : memref<1x8x1xf32, #tpu.memory_space<vmem>>, vector<1x8x1xf32>,
    } else {
    }
    %c0 = arith.constant 0 : index
    %c0_8 = arith.constant 0 : index
    %17 = vector.load %arg3[%c0, %c0_8] : memref<8x32xf32, #tpu.memory_space<vmem>>, vector<8x32xf32>
    %c0_9 = arith.constant 0 : index
    %c0_10 = arith.constant 0 : index
    %18 = vector.load %arg4[%c0_9, %c0_10] : memref<128x32xf32, #tpu.memory_space<vmem>>, vector<128x32xf32>
    %cst_11 = arith.constant dense<0.000000e+00> : vector<8x128xf32>
    %19 = tpu.matmul %17, %18, %cst_11 {dimension_numbers = #tpu.dot_dimension_numbers<[1], [1], [0], [0], [0, 0, 1, 0], [], []>} : vector<8x32xf32>, vector<128x32xf32>, vector<8x128xf32> -> vector<8x128xf32>
    %c0_12 = arith.constant 0 : index
    %c0_13 = arith.constant 0 : index
    %20 = vector.load %arg5[%c0_12, %c0_13] : memref<8x1xi32, #tpu.memory_space<vmem>>, vector<8x1xi32>
    %21 = tpu.iota {dimensions = array<i32: 1>} : vector<8x128xi32>
    %c128_i32 = arith.constant 128 : i32
    %22 = arith.muli %arg1, %c128_i32 : i32
    %23 = vector.broadcast %22 : i32 to vector<8x128xi32>
    %24 = arith.addi %21, %23 : vector<8x128xi32>
    %25 = vector.broadcast %20 : vector<8x1xi32> to vector<8x128xi32>
    %26 = arith.cmpi eq, %24, %25 : vector<8x128xi32>
    %c0_i32_14 = arith.constant 0 : i32
    %27 = arith.cmpi eq, %arg0, %c0_i32_14 : i32
    %28 = arith.extui %27 : i1 to i32
    %cst_15 = arith.constant 6.400000e+01 : f32
    %cst_16 = arith.constant -1.000000e+30 : f32
    %c0_i32_17 = arith.constant 0 : i32
    %29 = arith.cmpi ne, %28, %c0_i32_17 : i32
    scf.if %29 {
      %33 = vector.broadcast %cst_15 : f32 to vector<8x128xf32>
      %34 = arith.mulf %33, %19 : vector<8x128xf32>
      %35 = vector.broadcast %cst_16 : f32 to vector<8x128xf32>
      %36 = arith.select %26, %35, %34 : vector<8x128xi1>, vector<8x128xf32>
      %37 = arith.index_cast %arg2 : i32 to index
      %c0_23 = arith.constant 0 : index
      %c0_24 = arith.constant 0 : index
      %38 = vector.load %arg7[%37, %c0_23, %c0_24] : memref<1x8x1xf32, #tpu.memory_space<vmem>>, vector<1x8x1xf32>
      %39 = vector.shape_cast %38 : vector<1x8x1xf32> to vector<8x1xf32>
      %cst_25 = arith.constant dense<0xFF800000> : vector<8xf32>
      %40 = vector.multi_reduction <maximumf>, %36, %cst_25 [1] : vector<8x128xf32> to vector<8xf32>
      %41 = vector.shape_cast %40 : vector<8xf32> to vector<8x1xf32>
      %42 = arith.maximumf %39, %41 : vector<8x1xf32>
      %43 = arith.index_cast %arg2 : i32 to index
      %c0_26 = arith.constant 0 : index
      %c0_27 = arith.constant 0 : index
      %44 = vector.load %arg8[%43, %c0_26, %c0_27] : memref<1x8x1xf32, #tpu.memory_space<vmem>>, vector<1x8x1xf32>
      %45 = vector.shape_cast %44 : vector<1x8x1xf32> to vector<8x1xf32>
      %46 = arith.subf %39, %42 : vector<8x1xf32>
      %47 = math.exp %46 : vector<8x1xf32>
      %48 = arith.mulf %45, %47 : vector<8x1xf32>
      %49 = vector.broadcast %42 : vector<8x1xf32> to vector<8x128xf32>
      %50 = arith.subf %36, %49 : vector<8x128xf32>
      %51 = math.exp %50 : vector<8x128xf32>
      %cst_28 = arith.constant dense<0.000000e+00> : vector<8xf32>
      %52 = vector.multi_reduction <add>, %51, %cst_28 [1] : vector<8x128xf32> to vector<8xf32>
      %53 = vector.shape_cast %52 : vector<8xf32> to vector<8x1xf32>
      %54 = arith.addf %48, %53 : vector<8x1xf32>
      %55 = arith.index_cast %arg2 : i32 to index
      %c0_29 = arith.constant 0 : index
      %c0_30 = arith.constant 0 : index
      %56 = vector.load %arg8[%55, %c0_29, %c0_30] : memref<1x8x1xf32, #tpu.memory_space<vmem>>, vector<1x8x1xf32>
      %57 = vector.shape_cast %56 : vector<1x8x1xf32> to vector<8x1xf32>
      %58 = vector.shape_cast %54 : vector<8x1xf32> to vector<1x8x1xf32>
      tpu.vector_store %arg8[%55, %c0_29, %c0_30], %58 {strides = array<i32>} : memref<1x8x1xf32, #tpu.memory_space<vmem>>, vector<1x8x1xf32>,
      %59 = arith.index_cast %arg2 : i32 to index
      %c0_31 = arith.constant 0 : index
      %c0_32 = arith.constant 0 : index
      %60 = vector.load %arg7[%59, %c0_31, %c0_32] : memref<1x8x1xf32, #tpu.memory_space<vmem>>, vector<1x8x1xf32>
      %61 = vector.shape_cast %60 : vector<1x8x1xf32> to vector<8x1xf32>
      %62 = vector.shape_cast %42 : vector<8x1xf32> to vector<1x8x1xf32>
      tpu.vector_store %arg7[%59, %c0_31, %c0_32], %62 {strides = array<i32>} : memref<1x8x1xf32, #tpu.memory_space<vmem>>, vector<1x8x1xf32>,
      %c0_i32_33 = arith.constant 0 : i32
      %63 = arith.cmpi eq, %arg1, %c0_i32_33 : i32
      %64 = arith.extui %63 : i1 to i32
      %c0_i32_34 = arith.constant 0 : i32
      %65 = arith.cmpi ne, %64, %c0_i32_34 : i32
      scf.if %65 {
        %66 = arith.index_cast %arg2 : i32 to index
        %c0_35 = arith.constant 0 : index
        %c0_36 = arith.constant 0 : index
        %67 = vector.load %arg7[%66, %c0_35, %c0_36] : memref<1x8x1xf32, #tpu.memory_space<vmem>>, vector<1x8x1xf32>
        %68 = vector.shape_cast %67 : vector<1x8x1xf32> to vector<8x1xf32>
        %69 = arith.index_cast %arg2 : i32 to index
        %c0_37 = arith.constant 0 : index
        %c0_38 = arith.constant 0 : index
        %70 = vector.load %arg8[%69, %c0_37, %c0_38] : memref<1x8x1xf32, #tpu.memory_space<vmem>>, vector<1x8x1xf32>
        %71 = vector.shape_cast %70 : vector<1x8x1xf32> to vector<8x1xf32>
        %72 = math.log %71 : vector<8x1xf32>
        %73 = arith.addf %68, %72 : vector<8x1xf32>
        %c0_39 = arith.constant 0 : index
        %c0_40 = arith.constant 0 : index
        %74 = vector.load %arg9[%c0_39, %c0_40] : memref<1x1xf32, #tpu.memory_space<vmem>>, vector<1x1xf32>
        %cst_41 = arith.constant dense<0.000000e+00> : vector<1xf32>
        %75 = vector.multi_reduction <add>, %73, %cst_41 [0] : vector<8x1xf32> to vector<1xf32>
        %76 = vector.shape_cast %75 : vector<1xf32> to vector<1x1xf32>
        %77 = arith.addf %74, %76 : vector<1x1xf32>
        %c0_42 = arith.constant 0 : index
        %c0_43 = arith.constant 0 : index
        %78 = vector.load %arg9[%c0_42, %c0_43] : memref<1x1xf32, #tpu.memory_space<vmem>>, vector<1x1xf32>
        tpu.vector_store %arg9[%c0_42, %c0_43], %77 {strides = array<i32>} : memref<1x1xf32, #tpu.memory_space<vmem>>, vector<1x1xf32>,
      } else {
      }
    } else {
    }
    %c1_i32_18 = arith.constant 1 : i32
    %30 = arith.cmpi eq, %arg0, %c1_i32_18 : i32
    %31 = arith.extui %30 : i1 to i32
    %cst_19 = arith.constant 1.250000e-01 : f32
    %cst_20 = arith.constant 6.400000e+01 : f32
    %cst_21 = arith.constant 6.400000e+00 : f32
    %c0_i32_22 = arith.constant 0 : i32
    %32 = arith.cmpi ne, %31, %c0_i32_22 : i32
    scf.if %32 {
      %c0_23 = arith.constant 0 : index
      %c0_24 = arith.constant 0 : index
      %33 = vector.load %arg9[%c0_23, %c0_24] : memref<1x1xf32, #tpu.memory_space<vmem>>, vector<1x1xf32>
      %34 = vector.broadcast %cst_19 : f32 to vector<1x1xf32>
      %35 = arith.mulf %33, %34 : vector<1x1xf32>
      %36 = vector.broadcast %cst_20 : f32 to vector<8x128xf32>
      %37 = arith.mulf %36, %19 : vector<8x128xf32>
      %38 = vector.broadcast %35 : vector<1x1xf32> to vector<8x128xf32>
      %39 = arith.subf %37, %38 : vector<8x128xf32>
      %cst_25 = arith.constant 0.000000e+00 : f32
      %40 = arith.subf %cst_25, %cst_20 : f32
      %41 = vector.broadcast %40 : f32 to vector<8x128xf32>
      %42 = arith.maximumf %41, %39 : vector<8x128xf32>
      %43 = vector.broadcast %cst_20 : f32 to vector<8x128xf32>
      %44 = arith.minimumf %43, %42 : vector<8x128xf32>
      %cst_26 = arith.constant 0.000000e+00 : f32
      %45 = vector.broadcast %cst_26 : f32 to vector<8x128xf32>
      %46 = arith.maximumf %44, %45 : vector<8x128xf32>
      %47 = math.absf %44 : vector<8x128xf32>
      %cst_27 = arith.constant 0.000000e+00 : f32
      %48 = vector.broadcast %cst_27 : f32 to vector<8x128xf32>
      %49 = arith.subf %48, %47 : vector<8x128xf32>
      %50 = math.exp %49 : vector<8x128xf32>
      %cst_28 = arith.constant 1.000000e+00 : f32
      %51 = vector.broadcast %cst_28 : f32 to vector<8x128xf32>
      %52 = arith.addf %51, %50 : vector<8x128xf32>
      %53 = math.log %52 : vector<8x128xf32>
      %54 = arith.addf %46, %53 : vector<8x128xf32>
      %cst_29 = arith.constant dense<0.000000e+00> : vector<8xf32>
      %55 = vector.multi_reduction <add>, %54, %cst_29 [1] : vector<8x128xf32> to vector<8xf32>
      %56 = vector.shape_cast %55 : vector<8xf32> to vector<8x1xf32>
      %cst_30 = arith.constant 0.000000e+00 : f32
      %57 = vector.broadcast %cst_30 : f32 to vector<8x128xf32>
      %58 = arith.select %26, %19, %57 : vector<8x128xi1>, vector<8x128xf32>
      %cst_31 = arith.constant dense<0.000000e+00> : vector<8xf32>
      %59 = vector.multi_reduction <add>, %58, %cst_31 [1] : vector<8x128xf32> to vector<8xf32>
      %60 = vector.shape_cast %59 : vector<8xf32> to vector<8x1xf32>
      %61 = arith.extui %26 : vector<8x128xi1> to vector<8x128xi32>
      %62 = arith.sitofp %61 : vector<8x128xi32> to vector<8x128xf32>
      %cst_32 = arith.constant dense<0.000000e+00> : vector<8xf32>
      %63 = vector.multi_reduction <add>, %62, %cst_32 [1] : vector<8x128xf32> to vector<8xf32>
      %64 = vector.shape_cast %63 : vector<8xf32> to vector<8x1xf32>
      %65 = vector.broadcast %cst_20 : f32 to vector<8x1xf32>
      %66 = arith.mulf %65, %60 : vector<8x1xf32>
      %67 = vector.broadcast %35 : vector<1x1xf32> to vector<8x1xf32>
      %68 = arith.subf %66, %67 : vector<8x1xf32>
      %69 = vector.broadcast %cst_21 : f32 to vector<8x1xf32>
      %70 = arith.subf %68, %69 : vector<8x1xf32>
      %cst_33 = arith.constant 0.000000e+00 : f32
      %71 = arith.subf %cst_33, %cst_20 : f32
      %72 = vector.broadcast %71 : f32 to vector<8x1xf32>
      %73 = arith.maximumf %72, %70 : vector<8x1xf32>
      %74 = vector.broadcast %cst_20 : f32 to vector<8x1xf32>
      %75 = arith.minimumf %74, %73 : vector<8x1xf32>
      %cst_34 = arith.constant 0.000000e+00 : f32
      %76 = vector.broadcast %cst_34 : f32 to vector<8x1xf32>
      %77 = arith.subf %76, %75 : vector<8x1xf32>
      %cst_35 = arith.constant 0.000000e+00 : f32
      %78 = vector.broadcast %cst_35 : f32 to vector<8x1xf32>
      %79 = arith.maximumf %77, %78 : vector<8x1xf32>
      %80 = math.absf %77 : vector<8x1xf32>
      %cst_36 = arith.constant 0.000000e+00 : f32
      %81 = vector.broadcast %cst_36 : f32 to vector<8x1xf32>
      %82 = arith.subf %81, %80 : vector<8x1xf32>
      %83 = math.exp %82 : vector<8x1xf32>
      %cst_37 = arith.constant 1.000000e+00 : f32
      %84 = vector.broadcast %cst_37 : f32 to vector<8x1xf32>
      %85 = arith.addf %84, %83 : vector<8x1xf32>
      %86 = math.log %85 : vector<8x1xf32>
      %87 = arith.addf %79, %86 : vector<8x1xf32>
      %cst_38 = arith.constant 0.000000e+00 : f32
      %88 = arith.subf %cst_38, %cst_20 : f32
      %89 = vector.broadcast %88 : f32 to vector<8x1xf32>
      %90 = arith.maximumf %89, %68 : vector<8x1xf32>
      %91 = vector.broadcast %cst_20 : f32 to vector<8x1xf32>
      %92 = arith.minimumf %91, %90 : vector<8x1xf32>
      %cst_39 = arith.constant 0.000000e+00 : f32
      %93 = vector.broadcast %cst_39 : f32 to vector<8x1xf32>
      %94 = arith.maximumf %92, %93 : vector<8x1xf32>
      %95 = math.absf %92 : vector<8x1xf32>
      %cst_40 = arith.constant 0.000000e+00 : f32
      %96 = vector.broadcast %cst_40 : f32 to vector<8x1xf32>
      %97 = arith.subf %96, %95 : vector<8x1xf32>
      %98 = math.exp %97 : vector<8x1xf32>
      %cst_41 = arith.constant 1.000000e+00 : f32
      %99 = vector.broadcast %cst_41 : f32 to vector<8x1xf32>
      %100 = arith.addf %99, %98 : vector<8x1xf32>
      %101 = math.log %100 : vector<8x1xf32>
      %102 = arith.addf %94, %101 : vector<8x1xf32>
      %103 = arith.subf %87, %102 : vector<8x1xf32>
      %104 = arith.index_cast %arg2 : i32 to index
      %c0_42 = arith.constant 0 : index
      %c0_43 = arith.constant 0 : index
      %105 = vector.load %arg8[%104, %c0_42, %c0_43] : memref<1x8x1xf32, #tpu.memory_space<vmem>>, vector<1x8x1xf32>
      %106 = vector.shape_cast %105 : vector<1x8x1xf32> to vector<8x1xf32>
      %107 = arith.addf %106, %56 : vector<8x1xf32>
      %108 = arith.mulf %64, %103 : vector<8x1xf32>
      %109 = arith.addf %107, %108 : vector<8x1xf32>
      %110 = arith.index_cast %arg2 : i32 to index
      %c0_44 = arith.constant 0 : index
      %c0_45 = arith.constant 0 : index
      %111 = vector.load %arg8[%110, %c0_44, %c0_45] : memref<1x8x1xf32, #tpu.memory_space<vmem>>, vector<1x8x1xf32>
      %112 = vector.shape_cast %111 : vector<1x8x1xf32> to vector<8x1xf32>
      %113 = vector.shape_cast %109 : vector<8x1xf32> to vector<1x8x1xf32>
      tpu.vector_store %arg8[%110, %c0_44, %c0_45], %113 {strides = array<i32>} : memref<1x8x1xf32, #tpu.memory_space<vmem>>, vector<1x8x1xf32>,
      %c0_i32_46 = arith.constant 0 : i32
      %114 = arith.cmpi eq, %arg1, %c0_i32_46 : i32
      %115 = arith.extui %114 : i1 to i32
      %c0_i32_47 = arith.constant 0 : i32
      %116 = arith.cmpi ne, %115, %c0_i32_47 : i32
      scf.if %116 {
        %c0_48 = arith.constant 0 : index
        %c0_49 = arith.constant 0 : index
        %117 = vector.load %arg10[%c0_48, %c0_49] : memref<1x1xf32, #tpu.memory_space<vmem>>, vector<1x1xf32>
        %118 = arith.index_cast %arg2 : i32 to index
        %c0_50 = arith.constant 0 : index
        %c0_51 = arith.constant 0 : index
        %119 = vector.load %arg8[%118, %c0_50, %c0_51] : memref<1x8x1xf32, #tpu.memory_space<vmem>>, vector<1x8x1xf32>
        %120 = vector.shape_cast %119 : vector<1x8x1xf32> to vector<8x1xf32>
        %cst_52 = arith.constant dense<0.000000e+00> : vector<1xf32>
        %121 = vector.multi_reduction <add>, %120, %cst_52 [0] : vector<8x1xf32> to vector<1xf32>
        %122 = vector.shape_cast %121 : vector<1xf32> to vector<1x1xf32>
        %123 = arith.addf %117, %122 : vector<1x1xf32>
        %c0_53 = arith.constant 0 : index
        %c0_54 = arith.constant 0 : index
        %124 = vector.load %arg10[%c0_53, %c0_54] : memref<1x1xf32, #tpu.memory_space<vmem>>, vector<1x1xf32>
        tpu.vector_store %arg10[%c0_53, %c0_54], %123 {strides = array<i32>} : memref<1x1xf32, #tpu.memory_space<vmem>>, vector<1x1xf32>,
        %c0_i32_55 = arith.constant 0 : i32
        %125 = arith.cmpi eq, %arg2, %c0_i32_55 : i32
        %126 = arith.extui %125 : i1 to i32
        %c0_i32_56 = arith.constant 0 : i32
        %127 = arith.cmpi ne, %126, %c0_i32_56 : i32
        scf.if %127 {
          %c0_57 = arith.constant 0 : index
          %c0_58 = arith.constant 0 : index
          %128 = vector.load %arg10[%c0_57, %c0_58] : memref<1x1xf32, #tpu.memory_space<vmem>>, vector<1x1xf32>
          %129 = vector.broadcast %cst_19 : f32 to vector<1x1xf32>
          %130 = arith.mulf %128, %129 : vector<1x1xf32>
          %c0_59 = arith.constant 0 : index
          %c0_60 = arith.constant 0 : index
          %131 = vector.load %arg6[%c0_59, %c0_60] : memref<1x1xf32, #tpu.memory_space<vmem>>, vector<1x1xf32>
          tpu.vector_store %arg6[%c0_59, %c0_60], %130 {strides = array<i32>} : memref<1x1xf32, #tpu.memory_space<vmem>>, vector<1x1xf32>,
        } else {
        }
      } else {
      }
    } else {
    }
    return
  }
  func.func @transform_0(%arg0: i32, %arg1: i32, %arg2: i32) -> (i32, i32) {
    %c0_i32 = arith.constant 0 : i32
    %c0_i32_0 = arith.constant 0 : i32
    return %arg2, %c0_i32 : i32, i32
  }
  func.func @transform_1(%arg0: i32, %arg1: i32, %arg2: i32) -> (i32, i32) {
    %c0_i32 = arith.constant 0 : i32
    %c0_i32_0 = arith.constant 0 : i32
    return %arg1, %c0_i32 : i32, i32
  }
  func.func @transform_2(%arg0: i32, %arg1: i32, %arg2: i32) -> (i32, i32) {
    %c0_i32 = arith.constant 0 : i32
    %c0_i32_0 = arith.constant 0 : i32
    return %arg2, %c0_i32 : i32, i32
  }
  func.func @transform_3(%arg0: i32, %arg1: i32, %arg2: i32) -> (i32, i32) {
    %c0_i32 = arith.constant 0 : i32
    %c0_i32_0 = arith.constant 0 : i32
    %c0_i32_1 = arith.constant 0 : i32
    return %c0_i32, %c0_i32_0 : i32, i32
  }
}

</mosaic_0001>

<bundles_post_ra>
// kernel: tpu_custom_call.1
= control target key start
LH: loop header
LB: loop body
LE: loop exit
PB: predicated region body
PF: predicated region fallthrough
CT: control target
= control target key end

     0   :  { %8 = vsyncpa [#allocation7], 0  ;;  %s909_s12 = smov 0   ;;  %s911_s13 = smov 0   ;;  %s1066_s0 = inlined_call_operand.vmem [shape: f32[8,32], index: 0, kind: input, shape index: {}]   ;;  %s1067_s1 = inlined_call_operand.vmem [shape: f32[128,32], index: 1, kind: input, shape index: {}]   ;;  %s1068_s2 = inlined_call_operand.vmem [shape: s32[8,1], index: 2, kind: input, shape index: {}]   ;;  %s1069_s3 = inlined_call_operand.hbm [shape: f32[1,1], index: 3, kind: output, shape index: {}]  }
   0x1   :  { %s913_s14 = smov 0  }
   0x2 LB: > { %s636_s15 = sadd.s32 4294967295, %s875_s14   ;;  %s33_s16 = sadd.s32 1, %s871_s13  ;;  %s875_s14 = sphi %s913_s14, %s14_s14   ;;  %s871_s13 = sphi %s911_s13, %s1074_s13   ;;  %s867_s12 = sphi %s909_s12, %s1073_s12  }
   0x3   : > { %p35_p0 = scmp.ge.s32.totalorder %s33_s16, 2  ;;  %p641_p1 = scmp.ge.s32.totalorder %s875_s14, 1 }
   0x4   : > { %p171_p2 = scmp.lt.s32.totalorder %s875_s14, 3 }
   0x5   : > { %s1076_s16 = smov (%p35_p0, %s33_s16), 0 }
   0x6   : > { %p172_p3 = pnand %p641_p1, %p171_p2 }
   0x7   : > { %p212_p4 = scmp.eq.s32.totalorder (!%p172_p3), %s867_s12, 0 }
   0x8   : > { %175 = sbr.rel (%p172_p3) target bundleno = 1175 (0x497), region = 32 }
   0xf   : > { %220 = sbr.rel (!%p212_p4) target bundleno = 22 (0x16), region = 36  ;;  %vm221_vm0 = vcmask (%p212_p4), 0   ;;  %v877_v0 = vmov (%p212_p4), 0.0  }
  0x10   : > { %222 = vst.msk [vmem:[#allocation4] sm:$0x1] (%p212_p4), %vm221_vm0, %v877_v0  ;;  %223 = vst.msk [vmem:[#allocation5] sm:$0x1] (%p212_p4), %vm221_vm0, %v877_v0 }
  0x16 PF: > { %225 = sbr.rel (!%p212_p4) target bundleno = 29 (0x1d), region = 40  ;;  %vm228_vm1 = vcmask (%p212_p4), 7168   ;;  %v878_v1 = vmov (%p212_p4), -1e+30   ;;  %v879_v2 = vmov (%p212_p4), 0.0  }
  0x17   : > { %229 = vst.msk [vmem:[#allocation2] sm:$0xff] (%p212_p4), %vm228_vm1, %v878_v1  ;;  %231 = vst.msk [vmem:[#allocation3] sm:$0xff] (%p212_p4), %vm228_vm1, %v879_v2 }
  0x1d PF: > { %p232_p5 = scmp.eq.s32.totalorder %s867_s12, 1 }
  0x1e   : > { %vm239_vm2 = vcmask (%p232_p5), 7168   ;;  %v880_v3 = vmov (%p232_p5), 0.0  }
  0x1f   : > { %236 = sbr.rel (!%p232_p5) target bundleno = 38 (0x26), region = 44  ;;  %240 = vst.msk [vmem:[#allocation3] sm:$0xff] (%p232_p5), %vm239_vm2, %v880_v3 }
  0x26 PF: > { %v242_v4 = vld [vmem:[%s1067_s1] sm:$0xff]  ;;  %v243_v5 = vld [vmem:[%s1067_s1 + $0x8] sm:$0xff]  ;;  %vm258_vm3 = vcmask 261120   ;;  %v881_v6 = vmov 0.0|0.0   ;;  %vm882_vm5 = vmmov 0   ;;  %v883_v9 = vmov 0.0  }
  0x27   : > { %728 = vmatprep.subr.bf16.mxu0 %v881_v6  ;;  %v729_v7 = vpack.c.bf16 %v243_v5, %v242_v4  ;;  %vm940_vm4 = vmpackc.low %vm258_vm3, %vm258_vm3  ;;  %725 = vmatprep.mubr.msk.f32.mxu0 %vm882_vm5, %v883_v9  ;;  %v884_v10 = vmov 0   ;;  %v244_v11 = vld [vmem:[%s1067_s1 + $0x10] sm:$0xff]  ;;  %v245_v12 = vld [vmem:[%s1067_s1 + $0x18] sm:$0xff]  ;;  %v381_v34 = vlaneseq  ;;  %p662_p6 = scmp.ne.s32.totalorder %s867_s12, 0 }
  0x28   : > { %802 = vset.pattern.permute.xlu0 %v884_v10  ;;  %v380_v13 = vld [vmem:[%s1068_s2] sm:$0xff]  ;;  %v733_v14 = vpack.c.bf16 %v245_v12, %v244_v11  ;;  %v247_v16 = vld [vmem:[%s1067_s1 + $0x28] sm:$0xff]  ;;  %v248_v18 = vld [vmem:[%s1067_s1 + $0x30] sm:$0xff]  ;;  %v885_v41 = vmov (!%p662_p6), 0   ;;  %vm418_vm7 = vcmask (!%p662_p6), 7168   ;;  %vm438_vm8 = vcmask (!%p662_p6), 0  }
  0x29   : > { %731 = vmatpush3.bf16.xpose.msk.msra.mxu0 %vm940_vm4, %v729_v7  ;;  %387 = vperm.xlu0 %802, %v380_v13   ;;  %v246_v15 = vld [vmem:[%s1067_s1 + $0x20] sm:$0xff]  ;;  %v249_v19 = vld [vmem:[%s1067_s1 + $0x38] sm:$0xff]  ;;  %v251_v22 = vld [vmem:[%s1067_s1 + $0x48] sm:$0xff]  ;;  %v1009_v35 = vand.u32 127, %v381_v34 }
  0x2a   : > { %732 = vmatprep.subr.bf16.mxu0 %v881_v6  ;;  %v737_v17 = vpack.c.bf16 %v247_v16, %v246_v15  ;;  %v741_v20 = vpack.c.bf16 %v249_v19, %v248_v18  ;;  %v250_v21 = vld [vmem:[%s1067_s1 + $0x40] sm:$0xff]  ;;  %v252_v24 = vld [vmem:[%s1067_s1 + $0x50] sm:$0xff]  ;;  %v253_v25 = vld [vmem:[%s1067_s1 + $0x58] sm:$0xff] }
  0x2b   : > { %v745_v23 = vpack.c.bf16 %v251_v22, %v250_v21  ;;  %v749_v26 = vpack.c.bf16 %v253_v25, %v252_v24  ;;  %v254_v27 = vld [vmem:[%s1067_s1 + $0x60] sm:$0xff]  ;;  %v255_v28 = vld [vmem:[%s1067_s1 + $0x68] sm:$0xff]  ;;  %v256_v30 = vld [vmem:[%s1067_s1 + $0x70] sm:$0xff] }
  0x2c   : > { %v753_v29 = vpack.c.bf16 %v255_v28, %v254_v27  ;;  %v257_v31 = vld [vmem:[%s1067_s1 + $0x78] sm:$0xff]  ;;  %v241_v33 = vld [vmem:[%s1066_s0] sm:$0xff]  ;;  %v402_v52 = vld [vmem:[#allocation3] sm:$0xff] (!%p662_p6) }
  0x2d   : > { %v757_v32 = vpack.c.bf16 %v257_v31, %v256_v30  ;;  %803 = vset.pattern.permute.xlu0 (!%p662_p6), %v885_v41  ;;  %v397_v42 = vld [vmem:[#allocation2] sm:$0xff] (!%p662_p6)  ;;  %v429_v3 = vld [vmem:[#allocation4] sm:$0x1] (!%p662_p6) }
  0x31   : > { %735 = vmatpush3.bf16.xpose.msk.msra.mxu0 %vm940_vm4, %v733_v14 }
  0x32   : > { %736 = vmatprep.subr.bf16.mxu0 %v881_v6 }
  0x39   : > { %739 = vmatpush3.bf16.xpose.msk.msra.mxu0 %vm940_vm4, %v737_v17 }
  0x3a   : > { %740 = vmatprep.subr.bf16.mxu0 %v881_v6 }
  0x41   : > { %743 = vmatpush3.bf16.xpose.msk.msra.mxu0 %vm940_vm4, %v741_v20 }
  0x42   : > { %744 = vmatprep.subr.bf16.mxu0 %v881_v6 }
  0x49   : > { %747 = vmatpush3.bf16.xpose.msk.msra.mxu0 %vm940_vm4, %v745_v23 }
  0x4a   : > { %748 = vmatprep.subr.bf16.mxu0 %v881_v6 }
  0x51   : > { %751 = vmatpush3.bf16.xpose.msk.msra.mxu0 %vm940_vm4, %v749_v26 }
  0x52   : > { %752 = vmatprep.subr.bf16.mxu0 %v881_v6 }
  0x59   : > { %755 = vmatpush3.bf16.xpose.msk.msra.mxu0 %vm940_vm4, %v753_v29 }
  0x5a   : > { %756 = vmatprep.subr.bf16.mxu0 %v881_v6 }
  0x61   : > { %759 = vmatpush3.bf16.xpose.msk.msra.mxu0 %vm940_vm4, %v757_v32 }
  0x68   : > { %726 = vmatmul.mubr.msk.f32.vlgmr.msra.gmra.mrb[0].mxu0 %vm258_vm3, %v241_v33 }
  0xa8   : > { %v1011_v36 = vpop.permute.xlu0 %387 }
  0xa9   : > { %vm389_vm6 = vcmp.eq.s32.totalorder %v1009_v35, %v1011_v36 }
 0x136   : > { %392 = sbr.rel (%p662_p6) target bundleno = 789 (0x315), region = 48 }
 0x13b   : > { %v376_v37 = vpop.f32.mrb[0].mxu0 }
 0x13c   : > { %v727_v38 = vpop.f32.mrb[1].mxu0  ;;  %v393_v39 = vmul.f32 (!%p662_p6), 64.0, %v376_v37 }
 0x13e   : > { %v394_v40 = vsel %vm389_vm6, -1e+30, %v393_v39 }
 0x13f   : > { %398 = vmax.xlane.f32.xlu0 %v394_v40 }
 0x1cc   : > { %v399_v43 = vpop.xlane.xlu0 %398 }
 0x1cd   : > { %v400_v44 = vmax.f32 %v397_v42, %v399_v43 }
 0x1cf   : > { %v403_v45 = vsub.f32 %v397_v42, %v400_v44  ;;  %420 = vst.msk [vmem:[#allocation2] sm:$0xff] %vm418_vm7, %v400_v44  ;;  %409 = vperm.xlu0 %803, %v400_v44  }
 0x1d1   : > { %v404_v50 = vmul.f32 1.442695, %v403_v45 }
 0x1d6   : > { %v424_v59 = vld [vmem:[#allocation2] sm:$0xff] }
 0x24e   : > { %v410_v46 = vpop.permute.xlu0 %409 }
 0x24f   : > { %v412_v47 = vsub.f32 %v394_v40, %v410_v46 }
 0x251   : > { %v413_v48 = vmul.f32 1.442695, %v412_v47 }
 0x253   : > { %804 = vpow2.f32 %v413_v48 }
 0x254   : > { %806 = vpow2.f32 %v404_v50 }
 0x25d   : > { %v805_v49 = vpop.eup %804 }
 0x25e   : > { %415 = vadd.xlane.f32.xlu1 %v805_v49  ;;  %v807_v51 = vpop.eup %806 }
 0x25f   : > { %v406_v53 = vmul.f32 %v807_v51, %v402_v52 }
 0x2eb   : > { %v416_v54 = vpop.xlane.xlu1 %415 }
 0x2ec   : > { %v417_v55 = vadd.f32 %v416_v54, %v406_v53 }
 0x2ee   : > { %419 = vst.msk [vmem:[#allocation3] sm:$0xff] %vm418_vm7, %v417_v55 }
 0x2f5   : > { %v425_v56 = vld [vmem:[#allocation3] sm:$0xff] }
 0x2f6   : > { %808 = vlog2.f32 %v425_v56 }
 0x300   : > { %v809_v57 = vpop.eup %808 }
 0x301   : > { %v427_v58 = vmul.f32 0.6931472, %v809_v57 }
 0x303   : > { %v428_v60 = vadd.f32 %v427_v58, %v424_v59 }
 0x305   : > { %v430_v61 = vsel %vm418_vm7, %v428_v60, 0.0 }
 0x306   : > { %v431_v62 = vrot.slane %v430_v61, 4 }
 0x308   : > { %v432_v63 = vadd.f32 %v431_v62, %v430_v61 }
 0x30a   : > { %v433_v0 = vrot.slane %v432_v63, 2 }
 0x30c   : > { %v434_v1 = vadd.f32 %v433_v0, %v432_v63 }
 0x30e   : > { %v435_v2 = vrot.slane %v434_v1, 1 }
 0x310   : > { %v436_v4 = vadd.f32 %v435_v2, %v434_v1 }
 0x312   : > { %v437_v5 = vadd.f32 %v436_v4, %v429_v3 }
 0x314   : > { %439 = vst.msk [vmem:[#allocation4] sm:$0x1] %vm438_vm8, %v437_v5 }
 0x315 PF: > { %p663_p7 = scmp.ne.s32.totalorder %s867_s12, 1 }
 0x316   : > { %v448_v7 = vshrl.u32 (!%p663_p7), %v381_v34, 7  ;;  %v886_v8 = vmov (!%p663_p7), 0   ;;  %v469_v12 = vsel (!%p663_p7), %vm389_vm6, %v376_v37, 0.0  ;;  %v445_v13 = vmul.f32 (!%p663_p7), 64.0, %v376_v37  ;;  %v506_v54 = vld [vmem:[#allocation3] sm:$0xff] (!%p663_p7) }
 0x317   : > { %442 = sbr.rel (%p663_p7) target bundleno = 1150 (0x47e), region = 56  ;;  %810 = vset.pattern.permute.xlu0 (!%p663_p7), %v886_v8  ;;  %v887_v26 = vmov (!%p663_p7), 0.0   ;;  %vm510_vm9 = vcmask (!%p663_p7), 7168   ;;  %v515_v3 = vld [vmem:[#allocation5] sm:$0x1] (!%p663_p7)  ;;  %vm525_vm10 = vcmask (!%p663_p7), 0  }
 0x318   : > { %v449_v10 = vsub.s32 (!%p663_p7), 0, %v448_v7  ;;  %v665_v27 = vsel (!%p663_p7), %vm389_vm6, 1.0, %v887_v26 }
 0x31b   : > { %v443_v6 = vld [vmem:[#allocation4] sm:$0x1] (!%p663_p7) }
 0x31c   : > { %v444_v9 = vmul.f32 (!%p663_p7), 0.125, %v443_v6 }
 0x31e   : > { %v450_v11 = vrot.slane %v444_v9, %v449_v10 }
 0x320   : > { %452 = vperm.xlu0 %810, %v450_v11  }
 0x33f   : > { %470 = vadd.xlane.f32.xlu0 %v469_v12 }
 0x39f   : > { %v453_v14 = vpop.permute.xlu0 %452 }
 0x3a0   : > { %v455_v15 = vsub.f32 %v445_v13, %v453_v14 }
 0x3a2   : > { %v664_v16 = vclamps-f32 %v455_v15, 64.0 }
 0x3a4   : > { %v459_v17 = vand.u32 2147483647, %v664_v16  ;;  %v458_v23 = vmax.f32 %v664_v16, 0.0 }
 0x3a6   : > { %v460_v18 = vsub.f32 0.0, %v459_v17 }
 0x3a8   : > { %v461_v19 = vmul.f32 1.442695, %v460_v18 }
 0x3aa   : > { %811 = vpow2.f32 %v461_v19 }
 0x3b4   : > { %v812_v20 = vpop.eup %811 }
 0x3b5   : > { %v463_v21 = vadd.f32 1.0, %v812_v20 }
 0x3b7   : > { %813 = vlog2.f32 %v463_v21 }
 0x3c1   : > { %v814_v22 = vpop.eup %813 }
 0x3c2   : > { %v465_v24 = vmul.f32 0.6931472, %v814_v22 }
 0x3c4   : > { %v466_v25 = vadd.f32 %v465_v24, %v458_v23 }
 0x3c6   : > { %467 = vadd.xlane.f32.xlu1 %v466_v25 }
 0x3ca   : > { %474 = vadd.xlane.f32.xlu1 %v665_v27 }
 0x3cc   : > { %v471_v28 = vpop.xlane.xlu0 %470 }
 0x3cd   : > { %v476_v29 = vmul.f32 64.0, %v471_v28 }
 0x3cf   : > { %v478_v30 = vsub.f32 %v476_v29, %v450_v11 }
 0x3d1   : > { %v666_v31 = vadd.f32 -6.4, %v478_v30  ;;  %v668_v33 = vclamps-f32 %v478_v30, 64.0 }
 0x3d3   : > { %v667_v32 = vclamps-f32 %v666_v31, 64.0  ;;  %v495_v37 = vand.u32 2147483647, %v668_v33  ;;  %v494_v47 = vmax.f32 %v668_v33, 0.0 }
 0x3d5   : > { %v482_v34 = vsub.f32 0.0, %v667_v32  ;;  %v496_v39 = vsub.f32 0.0, %v495_v37 }
 0x3d7   : > { %v484_v38 = vand.u32 2147483647, %v482_v34  ;;  %v497_v41 = vmul.f32 1.442695, %v496_v39  ;;  %v483_v48 = vmax.f32 %v482_v34, 0.0 }
 0x3d9   : > { %v485_v40 = vsub.f32 0.0, %v484_v38  ;;  %815 = vpow2.f32 %v497_v41 }
 0x3db   : > { %v486_v42 = vmul.f32 1.442695, %v485_v40 }
 0x3dd   : > { %817 = vpow2.f32 %v486_v42 }
 0x3e3   : > { %v816_v43 = vpop.eup %815 }
 0x3e4   : > { %v499_v35 = vadd.f32 1.0, %v816_v43 }
 0x3e6   : > { %819 = vlog2.f32 %v499_v35 }
 0x3e7   : > { %v818_v44 = vpop.eup %817 }
 0x3e8   : > { %v488_v36 = vadd.f32 1.0, %v818_v44 }
 0x3ea   : > { %821 = vlog2.f32 %v488_v36 }
 0x3f0   : > { %v820_v45 = vpop.eup %819 }
 0x3f1   : > { %v501_v50 = vmul.f32 0.6931472, %v820_v45 }
 0x3f3   : > { %v502_v52 = vadd.f32 %v501_v50, %v494_v47 }
 0x3f4   : > { %v822_v46 = vpop.eup %821 }
 0x3f5   : > { %v490_v49 = vmul.f32 0.6931472, %v822_v46 }
 0x3f7   : > { %v491_v51 = vadd.f32 %v490_v49, %v483_v48 }
 0x3f9   : > { %v503_v55 = vsub.f32 %v491_v51, %v502_v52 }
 0x453   : > { %v468_v53 = vpop.xlane.xlu1 %467 }
 0x454   : > { %v507_v57 = vadd.f32 %v506_v54, %v468_v53 }
 0x457   : > { %v475_v56 = vpop.xlane.xlu1 %474 }
 0x458   : > { %v508_v58 = vmul.f32 %v503_v55, %v475_v56 }
 0x45a   : > { %v509_v59 = vadd.f32 %v508_v58, %v507_v57 }
 0x45c   : > { %511 = vst.msk [vmem:[#allocation3] sm:$0xff] %vm510_vm9, %v509_v59 }
 0x463   : > { %v516_v60 = vld [vmem:[#allocation3] sm:$0xff] }
 0x464   : > { %v517_v61 = vsel %vm510_vm9, %v516_v60, 0.0 }
 0x465   : > { %v518_v62 = vrot.slane %v517_v61, 4 }
 0x467   : > { %v519_v63 = vadd.f32 %v518_v62, %v517_v61 }
 0x469   : > { %v520_v0 = vrot.slane %v519_v63, 2 }
 0x46b   : > { %v521_v1 = vadd.f32 %v520_v0, %v519_v63 }
 0x46d   : > { %v522_v2 = vrot.slane %v521_v1, 1 }
 0x46f   : > { %v523_v4 = vadd.f32 %v522_v2, %v521_v1 }
 0x471   : > { %v524_v5 = vadd.f32 %v523_v4, %v515_v3 }
 0x473   : > { %526 = vst.msk [vmem:[#allocation5] sm:$0x1] %vm525_vm10, %v524_v5 }
 0x47a   : > { %v530_v6 = vld [vmem:[#allocation5] sm:$0x1] }
 0x47b   : > { %v531_v7 = vmul.f32 0.125, %v530_v6 }
 0x47d   : > { %532 = vst.msk [vmem:[#allocation6] sm:$0x1] %vm525_vm10, %v531_v7 }
 0x47e PF: > { %p1031_p8 = scmp.eq.s32.totalorder %s636_s15, 1  ;;  %s888_s4 = smov [#allocation6]  }
 0x47f   : > { %s540_s5 = sshll.u32 %s888_s4, 4  ;;  %s541_s5 = int_to_ptr.vmem [resolvable:$true] %s540_s5 }
 0x480   : > { %s823_s6 = scalar_lea.vmem %s541_s5, 16  ;;  %s829_s7 = scalar_lea.vmem %s541_s5, 32 }
 0x481   : > { %p824_p9 = scmp.ne.s32.totalorder %s541_s5, %s823_s6  ;;  %p830_p12 = scmp.lt.s32.totalorder %s541_s5, %s541_s5 }
 0x482   : > { %p831_p13 = scmp.lt.s32.totalorder %s829_s7, %s823_s6 }
 0x483   : > { %p825_p10 = pnand %p824_p9, %p1031_p8 }
 0x484   : > { %p832_p0 = por %p831_p13, %p830_p12 }
 0x485   : > { %p826_p11 = pneg %p825_p10 }
 0x487   : > { %p833_p1 = pnand %p832_p0, %p826_p11 }
 0x489   : > { %836 = shalt.err (!%p833_p1)
}
 0x48a   : > { %s837_s9 = scalar_lea.hbm %s1069_s3, 16 }
 0x48b   : > { %p838_p2 = scmp.ne.s32.totalorder %s1069_s3, %s837_s9  ;;  %p843_p5 = scmp.lt.u32.totalorder %s837_s9, %s1069_s3 }
 0x48d   : > { %p839_p3 = pnand %p838_p2, %p1031_p8 }
 0x48f   : > { %p840_p4 = pneg %p839_p3 }
 0x491   : > { %p845_p6 = pnand %p843_p5, %p840_p4 }
 0x493   : > { %848 = shalt.err (!%p845_p6)
}
 0x494   : > { %761 = dma.vmem_to_hbm [thread:$0]  (%p1031_p8), %s541_s5, 16, %s1069_s3, [#allocation7]  }
 0x495   : > { %862 = dma.done.wait (%p1031_p8), [#allocation7], 16  }
 0x496   : > { %864 = vsyncadd (%p1031_p8), [#allocation7], 4294967280 }
 0x497 PF: > { %s14_s14 = sadd.s32 1, %s875_s14   ;;  %s1073_s12 = smov %s871_s13 }
 0x498   : > { %p11_p7 = scmp.ge.s32.totalorder %s14_s14, 4   ;;  %s1074_s13 = smov %s1076_s16 }
 0x49a   :  { %13 = sbr.rel (!%p11_p7) target bundleno = 2 (0x2), region = 103 }
 0x4a1   :  { %553 = vsyncpa [#allocation7], 1 }
 0x4a2   :  { %555 = vsyncpa [#allocation7 + $0x1], 1 }

</bundles_post_ra>
